<compile_context>
chip_gen: v6e
topology: v6e:2x2x1
jax: 0.10.0
libtpu: 0.0.40
codegen_flags: <defaults>
</compile_context>

<pallas_src>
import functools

import jax
import jax.numpy as jnp
from jax.experimental import pallas as pl
from jax.experimental.pallas import tpu as pltpu

# ----------------------------------------------------------------------------
# Hyperparameters (small, synthetic).
# ----------------------------------------------------------------------------
VOCAB_SIZE = 50
EMBEDDING_DIM = 32
NUM_FILTERS = 8
FILTER_SIZES = (2, 3, 4)
NUM_LABELS = 2
DROPOUT = 0.5  # nn.Dropout is identity at inference; no-op in the kernel.

BATCH = 2
SEQ_LEN = 8

LANES = 128                                  # lane-dense width of every tensor
MAX_FS = max(FILTER_SIZES)                   # 4 tap blocks in the contraction
FEAT_DIM = len(FILTER_SIZES) * NUM_FILTERS   # 24 real feature lanes
BIAS_LANE = FEAT_DIM                         # lane 24 carries a constant 1.0
BATCH_BLOCK = 8                              # batch items per grid step (=> (8,128) out tile)
NEG_INF = jnp.float32(-1e30)


# ----------------------------------------------------------------------------
# Pallas kernel: one-hot (tap-blocked) embedding+conv matmul -> masked
# max-over-time -> ReLU -> lane-dense FC.  No lane slices / concats / rolls.
# ----------------------------------------------------------------------------
def _textcnn_kernel(tok_ref, w_big_ref, mask_ref, wfc_ref, out_ref, *,
                    seq_len, batch_block):
    # tok_ref holds (token_id + 128*tap) per lane, so a plain lane-iota compare
    # yields the exact one-hot: one 1.0 per 128-lane tap block per row.
    toks = tok_ref[...]                                            # (rows, 512) i32
    lane = jax.lax.broadcasted_iota(jnp.int32, toks.shape, 1)
    onehot = (toks == lane).astype(jnp.float32)                    # (rows, 512)

    # Embedding + every conv tap + conv bias + the constant-1 FC-bias feature
    # in ONE MXU matmul; each tap already lands in its group's output lanes.
    conv = jnp.dot(onehot, w_big_ref[...],
                   preferred_element_type=jnp.float32)             # (rows, 128)
    conv = conv.reshape(batch_block, seq_len, conv.shape[-1])      # (Bb, S, 128)

    # Additive validity mask (0 where the time row is valid for that group's
    # lanes, -1e30 elsewhere), max over time, then ReLU (relu(max)==max(relu)).
    pooled = jnp.max(conv + mask_ref[...], axis=1)                 # (Bb, 128)
    feats = jnp.maximum(pooled, 0.0)                               # lane 24 == 1.0

    # Dropout is identity at inference.  FC with lane-dense (128,128) weights,
    # bias folded into row BIAS_LANE; full-vreg (8,128) unmasked store.
    out_ref[...] = jnp.dot(feats, wfc_ref[...],
                           preferred_element_type=jnp.float32)


# ----------------------------------------------------------------------------
# One-time packing of PyTorch-layout params into the fused kernel layout.
# ----------------------------------------------------------------------------
def pack_params(params):
    emb_table, conv_ws, conv_bs, wfc, bfc = params
    V, _ = emb_table.shape
    hi = jax.lax.Precision.HIGHEST
    emb_pad = jnp.pad(emb_table, ((0, LANES - V), (0, 0)))          # (128, E)

    # W_big: MAX_FS tap blocks of 128 vocab rows each.  Block k, group g lanes
    # [g*F, (g+1)*F) hold emb_pad @ w_g[k]; conv bias folded into tap block 0;
    # column BIAS_LANE of block 0 is 1.0 (constant feature carrying the FC bias).
    blocks = []
    for k in range(MAX_FS):
        blk = jnp.zeros((LANES, LANES), jnp.float32)
        for g, fs in enumerate(FILTER_SIZES):
            if k < fs:
                wk = jnp.dot(emb_pad, conv_ws[g][k], precision=hi)   # (128, F)
                if k == 0:
                    wk = wk + conv_bs[g]                             # fold conv bias
                blk = blk.at[:, g * NUM_FILTERS:(g + 1) * NUM_FILTERS].set(wk)
        if k == 0:
            blk = blk.at[:, BIAS_LANE].set(1.0)
        blocks.append(blk)
    w_big = jnp.concatenate(blocks, axis=0)                          # (512, 128)

    # Additive (S, 128) time/lane validity mask (0 = keep, -1e30 = drop).
    mask = jnp.full((SEQ_LEN, LANES), NEG_INF, jnp.float32)
    for g, fs in enumerate(FILTER_SIZES):
        L = SEQ_LEN - fs + 1
        mask = mask.at[:L, g * NUM_FILTERS:(g + 1) * NUM_FILTERS].set(0.0)
    mask = mask.at[:, BIAS_LANE].set(0.0)                            # keep the 1.0

    # FC weights padded to (128, 128); bias folded into row BIAS_LANE.
    wfc_pad = jnp.zeros((LANES, LANES), jnp.float32)
    wfc_pad = wfc_pad.at[:FEAT_DIM, :NUM_LABELS].set(wfc)
    wfc_pad = wfc_pad.at[BIAS_LANE, :NUM_LABELS].set(bfc[0])
    return w_big, mask, wfc_pad


def textcnn_forward(tokens, packed):
    w_big, mask, wfc_pad = packed
    B, S = tokens.shape
    B_pad = ((B + BATCH_BLOCK - 1) // BATCH_BLOCK) * BATCH_BLOCK
    rows = B_pad * S

    # Lane-major token map: lane (k*128 + v) of row r holds token[r+k] + k*128,
    # so the in-kernel one-hot needs only an iota compare.  Cross-batch /
    # end-of-sequence bleed only hits time rows the mask discards.
    tok = jnp.pad(tokens.astype(jnp.int32), ((0, B_pad - B), (0, 0)))
    tok_flat = tok.reshape(-1)                                       # (rows,)
    idx = jnp.minimum(jnp.arange(rows)[:, None] + jnp.arange(MAX_FS)[None, :],
                      rows - 1)
    tok_shift = tok_flat[idx] + (jnp.arange(MAX_FS, dtype=jnp.int32) * LANES)[None, :]
    tok_map = jnp.repeat(tok_shift, LANES, axis=1)                   # (rows, 512)

    kernel = functools.partial(_textcnn_kernel, seq_len=S,
                               batch_block=BATCH_BLOCK)
    grid = (B_pad // BATCH_BLOCK,)
    out_pad = pl.pallas_call(
        kernel,
        grid=grid,
        in_specs=[
            pl.BlockSpec((BATCH_BLOCK * S, MAX_FS * LANES), lambda i: (i, 0)),
            pl.BlockSpec((MAX_FS * LANES, LANES), lambda i: (0, 0)),
            pl.BlockSpec((S, LANES), lambda i: (0, 0)),
            pl.BlockSpec((LANES, LANES), lambda i: (0, 0)),
        ],
        out_specs=pl.BlockSpec((BATCH_BLOCK, LANES), lambda i: (i, 0)),
        out_shape=jax.ShapeDtypeStruct((B_pad, LANES), jnp.float32),
        compiler_params=pltpu.CompilerParams(
            dimension_semantics=("parallel",)),   # shards row blocks on v7x's 2 TCs
    )(tok_map, w_big, mask, wfc_pad)
    return out_pad[:B, :NUM_LABELS]


# ----------------------------------------------------------------------------
# Pure-JAX reference (same math) for a correctness check.
# ----------------------------------------------------------------------------
def textcnn_reference(tokens, params):
    emb_table, conv_ws, conv_bs, wfc, bfc = params
    hi = jax.lax.Precision.HIGHEST
    emb = jnp.take(emb_table, tokens, axis=0)                        # (B, S, E)
    B, S, _ = emb.shape
    pooled = []
    for w, b, fs in zip(conv_ws, conv_bs, FILTER_SIZES):
        L = S - fs + 1
        out = jnp.zeros((B, L, NUM_FILTERS), jnp.float32)
        for k in range(fs):
            out = out + jnp.einsum('ble,ef->blf', emb[:, k:k + L, :], w[k],
                                   precision=hi)
        out = jnp.maximum(out + b[None, :, :], 0.0)
        pooled.append(jnp.max(out, axis=1))
    feats = jnp.concatenate(pooled, axis=1)
    return jnp.dot(feats, wfc, precision=hi) + bfc


# ----------------------------------------------------------------------------
# Deterministic parameter construction (synthetic weights, not a checkpoint).
# ----------------------------------------------------------------------------
def make_params(key):
    keys = jax.random.split(key, 3 + 2 * len(FILTER_SIZES))
    emb_table = 0.1 * jax.random.normal(
        keys[0], (VOCAB_SIZE, EMBEDDING_DIM), jnp.float32)
    conv_ws, conv_bs = [], []
    for i, fs in enumerate(FILTER_SIZES):
        conv_ws.append(0.1 * jax.random.normal(
            keys[1 + 2 * i], (fs, EMBEDDING_DIM, NUM_FILTERS), jnp.float32))
        conv_bs.append(0.1 * jax.random.normal(
            keys[2 + 2 * i], (1, NUM_FILTERS), jnp.float32))
    wfc = 0.1 * jax.random.normal(
        keys[-2], (len(FILTER_SIZES) * NUM_FILTERS, NUM_LABELS), jnp.float32)
    bfc = 0.1 * jax.random.normal(keys[-1], (1, NUM_LABELS), jnp.float32)
    return emb_table, conv_ws, conv_bs, wfc, bfc


if __name__ == "__main__":
    key = jax.random.PRNGKey(0)
    pkey, tkey = jax.random.split(key)
    params = make_params(pkey)
    packed = pack_params(params)  # one-time layout packing (outside hot path)
    tokens = jax.random.randint(tkey, (BATCH, SEQ_LEN), 0, VOCAB_SIZE,
                                dtype=jnp.int32)

    out = textcnn_forward(tokens, packed)
    out = jax.block_until_ready(out)

    ref = jax.block_until_ready(textcnn_reference(tokens, params))
    assert out.shape == (BATCH, NUM_LABELS)
    assert jnp.allclose(out, ref, atol=1e-4, rtol=1e-4), (out, ref)
    print("KERNEL_OK")
</pallas_src>

<mosaic_0001>
module attributes {stable_mosaic.version = 11 : i64} {
  func.func @_textcnn_kernel(%arg0: i32, %arg1: memref<64x512xi32, #tpu.memory_space<vmem>>, %arg2: memref<512x128xf32, #tpu.memory_space<vmem>>, %arg3: memref<8x128xf32, #tpu.memory_space<vmem>>, %arg4: memref<128x128xf32, #tpu.memory_space<vmem>>, %arg5: memref<8x128xf32, #tpu.memory_space<vmem>>) attributes {dimension_semantics = [#tpu.dimension_semantics<parallel>], iteration_bounds = array<i64: 1>, scalar_prefetch = 0 : i64, scratch_operands = 0 : i64, tpu.core_type = #tpu.core_type<tc>, window_params = [{transform_indices = @transform_0, window_bounds = array<i64: 64, 512>}, {pipeline_mode = #tpu.pipeline_mode<synchronous>, transform_indices = @transform_1, window_bounds = array<i64: 512, 128>}, {pipeline_mode = #tpu.pipeline_mode<synchronous>, transform_indices = @transform_2, window_bounds = array<i64: 8, 128>}, {pipeline_mode = #tpu.pipeline_mode<synchronous>, transform_indices = @transform_3, window_bounds = array<i64: 128, 128>}, {transform_indices = @transform_4, window_bounds = array<i64: 8, 128>}]} {
    %c0 = arith.constant 0 : index
    %c0_0 = arith.constant 0 : index
    %0 = vector.load %arg1[%c0, %c0_0] : memref<64x512xi32, #tpu.memory_space<vmem>>, vector<64x512xi32>
    %1 = tpu.iota {dimensions = array<i32: 1>} : vector<64x512xi32>
    %2 = arith.cmpi eq, %0, %1 : vector<64x512xi32>
    %3 = arith.extui %2 : vector<64x512xi1> to vector<64x512xi32>
    %4 = arith.sitofp %3 : vector<64x512xi32> to vector<64x512xf32>
    %c0_1 = arith.constant 0 : index
    %c0_2 = arith.constant 0 : index
    %5 = vector.load %arg2[%c0_1, %c0_2] : memref<512x128xf32, #tpu.memory_space<vmem>>, vector<512x128xf32>
    %cst = arith.constant dense<0.000000e+00> : vector<64x128xf32>
    %6 = tpu.matmul %4, %5, %cst {dimension_numbers = #tpu.dot_dimension_numbers<[1], [0], [0], [1], [0, 0, 1, 1], [], []>} : vector<64x512xf32>, vector<512x128xf32>, vector<64x128xf32> -> vector<64x128xf32>
    %7 = vector.shape_cast %6 : vector<64x128xf32> to vector<8x8x128xf32>
    %c0_3 = arith.constant 0 : index
    %c0_4 = arith.constant 0 : index
    %8 = vector.load %arg3[%c0_3, %c0_4] : memref<8x128xf32, #tpu.memory_space<vmem>>, vector<8x128xf32>
    %9 = vector.shape_cast %8 : vector<8x128xf32> to vector<1x8x128xf32>
    %10 = vector.broadcast %9 : vector<1x8x128xf32> to vector<8x8x128xf32>
    %11 = arith.addf %7, %10 : vector<8x8x128xf32>
    %cst_5 = arith.constant dense<0xFF800000> : vector<8x128xf32>
    %12 = vector.multi_reduction <maximumf>, %11, %cst_5 [1] : vector<8x8x128xf32> to vector<8x128xf32>
    %cst_6 = arith.constant 0.000000e+00 : f32
    %13 = vector.broadcast %cst_6 : f32 to vector<8x128xf32>
    %14 = arith.maximumf %12, %13 : vector<8x128xf32>
    %c0_7 = arith.constant 0 : index
    %c0_8 = arith.constant 0 : index
    %15 = vector.load %arg4[%c0_7, %c0_8] : memref<128x128xf32, #tpu.memory_space<vmem>>, vector<128x128xf32>
    %cst_9 = arith.constant dense<0.000000e+00> : vector<8x128xf32>
    %16 = tpu.matmul %14, %15, %cst_9 {dimension_numbers = #tpu.dot_dimension_numbers<[1], [0], [0], [1], [0, 0, 1, 1], [], []>} : vector<8x128xf32>, vector<128x128xf32>, vector<8x128xf32> -> vector<8x128xf32>
    %c0_10 = arith.constant 0 : index
    %c0_11 = arith.constant 0 : index
    %17 = vector.load %arg5[%c0_10, %c0_11] : memref<8x128xf32, #tpu.memory_space<vmem>>, vector<8x128xf32>
    tpu.vector_store %arg5[%c0_10, %c0_11], %16 {strides = array<i32>} : memref<8x128xf32, #tpu.memory_space<vmem>>, vector<8x128xf32>,
    return
  }
  func.func @transform_0(%arg0: i32) -> (i32, i32) {
    %c0_i32 = arith.constant 0 : i32
    %c0_i32_0 = arith.constant 0 : i32
    return %arg0, %c0_i32 : i32, i32
  }
  func.func @transform_1(%arg0: i32) -> (i32, i32) {
    %c0_i32 = arith.constant 0 : i32
    %c0_i32_0 = arith.constant 0 : i32
    %c0_i32_1 = arith.constant 0 : i32
    return %c0_i32, %c0_i32_0 : i32, i32
  }
  func.func @transform_2(%arg0: i32) -> (i32, i32) {
    %c0_i32 = arith.constant 0 : i32
    %c0_i32_0 = arith.constant 0 : i32
    %c0_i32_1 = arith.constant 0 : i32
    return %c0_i32, %c0_i32_0 : i32, i32
  }
  func.func @transform_3(%arg0: i32) -> (i32, i32) {
    %c0_i32 = arith.constant 0 : i32
    %c0_i32_0 = arith.constant 0 : i32
    %c0_i32_1 = arith.constant 0 : i32
    return %c0_i32, %c0_i32_0 : i32, i32
  }
  func.func @transform_4(%arg0: i32) -> (i32, i32) {
    %c0_i32 = arith.constant 0 : i32
    %c0_i32_0 = arith.constant 0 : i32
    return %arg0, %c0_i32 : i32, i32
  }
}

</mosaic_0001>

<bundles_post_ra>
// kernel: tpu_custom_call.1
= control target key start
LH: loop header
LB: loop body
LE: loop exit
PB: predicated region body
PF: predicated region fallthrough
CT: control target
= control target key end

     0   :  { %9 = vsyncpa [#allocation3], 0  ;;  %s1161_s0 = inlined_call_operand.hbm [shape: s32[64,512], index: 0, kind: input, shape index: {}]   ;;  %s1162_s1 = inlined_call_operand.hbm [shape: f32[512,128], index: 1, kind: input, shape index: {}]   ;;  %s1163_s2 = inlined_call_operand.hbm [shape: f32[8,128], index: 2, kind: input, shape index: {}]   ;;  %s1164_s3 = inlined_call_operand.hbm [shape: f32[128,128], index: 3, kind: input, shape index: {}]   ;;  %s1165_s4 = inlined_call_operand.hbm [shape: f32[8,128], index: 4, kind: output, shape index: {}]  }
   0x1   :  { %10 = vsyncpa [#allocation6], 0 }
   0x2   :  { %11 = vsyncpa [#allocation9], 0 }
   0x3   :  { %12 = vsyncpa [#allocation4], 0  ;;  %s1018_s15 = smov [#allocation5]  }
   0x4   :  { %s30_s16 = sshll.u32 %s1018_s15, 4  ;;  %s31_s16 = int_to_ptr.vmem [resolvable:$true] %s30_s16 }
   0x5   :  { %s918_s17 = scalar_lea.vmem %s31_s16, 8192  ;;  %p923_p1 = scmp.lt.s32.totalorder %s31_s16, %s31_s16 }
   0x6   :  { %p919_p0 = scmp.ne.s32.totalorder %s31_s16, %s918_s17  ;;  %p924_p2 = scmp.lt.s32.totalorder %s918_s17, %s918_s17 }
   0x8   :  { %p925_p3 = por %p924_p2, %p923_p1 }
   0xa   :  { %p926_p4 = pnand %p925_p3, %p919_p0 }
   0xc   :  { %929 = shalt.err (!%p926_p4)
}
   0xd   :  { %s1019_s18 = smov 128   ;;  %s1020_s19 = smov 8  }
   0xe   :  { %36 = dma.hbm_to_vmem [thread:$0]  %s1162_s1, 8192, %s31_s16, [#allocation6], %s1019_s18, %s1019_s18, %s1020_s19  }
   0xf   :  { %s1021_s22 = smov [#allocation2]  }
  0x10   :  { %s18_s23 = sshll.u32 %s1021_s22, 4  ;;  %s19_s23 = int_to_ptr.vmem [resolvable:$true] %s18_s23 }
  0x11   :  { %s938_s24 = scalar_lea.vmem %s19_s23, 4096  ;;  %p943_p6 = scmp.lt.s32.totalorder %s19_s23, %s19_s23 }
  0x12   :  { %p939_p5 = scmp.ne.s32.totalorder %s19_s23, %s938_s24  ;;  %p944_p7 = scmp.lt.s32.totalorder %s938_s24, %s938_s24 }
  0x14   :  { %p945_p8 = por %p944_p7, %p943_p6 }
  0x16   :  { %p946_p9 = pnand %p945_p8, %p939_p5 }
  0x18   :  { %949 = shalt.err (!%p946_p9)
}
  0x19   :  { %s1022_s25 = smov 512   ;;  %s1023_s26 = smov 32  }
  0x1a   :  { %24 = dma.hbm_to_vmem [thread:$0]  %s1161_s0, 4096, %s19_s23, [#allocation3], %s1022_s25, %s1022_s25, %s1023_s26  }
  0x1b   :  { %s1024_s29 = smov [#allocation7]   ;;  %s1025_s5 = smov [#allocation8]  }
  0x1c   :  { %s43_s30 = sshll.u32 %s1024_s29, 4  ;;  %s52_s1 = sshll.u32 %s1025_s5, 4  ;;  %s44_s30 = int_to_ptr.vmem [resolvable:$true] %s43_s30  ;;  %s53_s1 = int_to_ptr.vmem [resolvable:$true] %s52_s1 }
  0x1d   :  { %s958_s6 = scalar_lea.vmem %s44_s30, 128  ;;  %p963_p11 = scmp.lt.s32.totalorder %s44_s30, %s44_s30 }
  0x1e   :  { %p959_p10 = scmp.ne.s32.totalorder %s44_s30, %s958_s6  ;;  %p964_p12 = scmp.lt.s32.totalorder %s958_s6, %s958_s6 }
  0x20   :  { %p965_p13 = por %p964_p12, %p963_p11 }
  0x22   :  { %p966_p0 = pnand %p965_p13, %p959_p10 }
  0x24   :  { %969 = shalt.err (!%p966_p0)
}
  0x25   :  { %46 = dma.hbm_to_vmem [thread:$0]  %s1163_s2, 128, %s44_s30, [#allocation6]  }
  0x26   :  { %s978_s9 = scalar_lea.vmem %s53_s1, 2048  ;;  %p983_p2 = scmp.lt.s32.totalorder %s53_s1, %s53_s1 }
  0x27   :  { %p979_p1 = scmp.ne.s32.totalorder %s53_s1, %s978_s9  ;;  %p984_p3 = scmp.lt.s32.totalorder %s978_s9, %s978_s9 }
  0x29   :  { %p985_p4 = por %p984_p3, %p983_p2 }
  0x2b   :  { %p986_p5 = pnand %p985_p4, %p979_p1 }
  0x2d   :  { %989 = shalt.err (!%p986_p5)
}
  0x2e   :  { %58 = dma.hbm_to_vmem [thread:$0]  %s1164_s3, 2048, %s53_s1, [#allocation9], %s1019_s18, %s1019_s18, %s1020_s19  }
  0x2f   :  { %1010 = dma.done.wait [#allocation3], 4096  }
  0x30   :  { %1011 = vsyncadd [#allocation3], 4294963200 }
  0x31   :  { %1012 = dma.done.wait [#allocation6], 8320  }
  0x32   :  { %1013 = vsyncadd [#allocation6], 4294958976 }
  0x33   :  { %1014 = dma.done.wait [#allocation9], 2048  }
  0x34   :  { %1015 = vsyncadd [#allocation9], 4294965248  ;;  %v235_v0 = vld [vmem:[#allocation5 + $0xf8] sm:$0xff]  ;;  %v234_v4 = vld [vmem:[#allocation5 + $0xf0] sm:$0xff]  ;;  %v103_v40 = vlaneseq  ;;  %s1029_s2 = smov [#allocation10]  }
  0x35   :  { %v267_v1 = vld [vmem:[#allocation5 + $0x1f8] sm:$0xff]  ;;  %734 = vmatprep.subr.mxu0 %v235_v0  ;;  %v266_v5 = vld [vmem:[#allocation5 + $0x1f0] sm:$0xff]  ;;  %v233_v8 = vld [vmem:[#allocation5 + $0xe8] sm:$0xff]  ;;  %s659_s3 = sshll.u32 %s1029_s2, 4  ;;  %s660_s3 = int_to_ptr.vmem [resolvable:$true] %s659_s3 }
  0x36   :  { %v219_v2 = vld [vmem:[#allocation5 + $0x78] sm:$0xff]  ;;  %790 = vmatprep.subr.mxu1 %v267_v1  ;;  %v218_v6 = vld [vmem:[#allocation5 + $0x70] sm:$0xff]  ;;  %v265_v9 = vld [vmem:[#allocation5 + $0x1e8] sm:$0xff]  ;;  %v1073_v49 = vand.u32 127, %v103_v40  ;;  %s990_s11 = scalar_lea.vmem %s660_s3, 128  ;;  %p995_p7 = scmp.lt.s32.totalorder %s660_s3, %s660_s3 }
  0x37   :  { %v251_v3 = vld [vmem:[#allocation5 + $0x178] sm:$0xff]  ;;  %735 = vmatpush3.msra.mxu0 %v219_v2  ;;  %v250_v7 = vld [vmem:[#allocation5 + $0x170] sm:$0xff]  ;;  %v217_v10 = vld [vmem:[#allocation5 + $0x68] sm:$0xff]  ;;  %p991_p6 = scmp.ne.s32.totalorder %s660_s3, %s990_s11  ;;  %p996_p8 = scmp.lt.s32.totalorder %s990_s11, %s990_s11 }
  0x38   :  { %791 = vmatpush3.msra.mxu1 %v251_v3  ;;  %736 = vmatprep.subr.mxu0 %v234_v4  ;;  %v249_v11 = vld [vmem:[#allocation5 + $0x168] sm:$0xff]  ;;  %v232_v12 = vld [vmem:[#allocation5 + $0xe0] sm:$0xff]  ;;  %v231_v16 = vld [vmem:[#allocation5 + $0xd8] sm:$0xff]  ;;  %v1076_v59 = vadd.s32 128, %v1073_v49  ;;  %v1079_v63 = vadd.s32 384, %v1073_v49  ;;  %v1082_v3 = vadd.s32 256, %v1073_v49 }
  0x39   :  { %792 = vmatprep.subr.mxu1 %v266_v5  ;;  %737 = vmatpush3.msra.mxu0 %v218_v6  ;;  %v264_v13 = vld [vmem:[#allocation5 + $0x1e0] sm:$0xff]  ;;  %v263_v17 = vld [vmem:[#allocation5 + $0x1d8] sm:$0xff]  ;;  %v230_v20 = vld [vmem:[#allocation5 + $0xd0] sm:$0xff]  ;;  %p997_p9 = por %p996_p8, %p995_p7 }
  0x3a   :  { %793 = vmatpush3.msra.mxu1 %v250_v7  ;;  %738 = vmatprep.subr.mxu0 %v233_v8  ;;  %v216_v14 = vld [vmem:[#allocation5 + $0x60] sm:$0xff]  ;;  %v215_v18 = vld [vmem:[#allocation5 + $0x58] sm:$0xff]  ;;  %v262_v21 = vld [vmem:[#allocation5 + $0x1d0] sm:$0xff] }
  0x3b   :  { %794 = vmatprep.subr.mxu1 %v265_v9  ;;  %v248_v15 = vld [vmem:[#allocation5 + $0x160] sm:$0xff]  ;;  %739 = vmatpush3.msra.mxu0 %v217_v10  ;;  %v247_v19 = vld [vmem:[#allocation5 + $0x158] sm:$0xff]  ;;  %v214_v22 = vld [vmem:[#allocation5 + $0x50] sm:$0xff]  ;;  %p998_p10 = pnand %p997_p9, %p991_p6 }
  0x3c   :  { %795 = vmatpush3.msra.mxu1 %v249_v11  ;;  %740 = vmatprep.subr.mxu0 %v232_v12  ;;  %v246_v23 = vld [vmem:[#allocation5 + $0x150] sm:$0xff]  ;;  %v229_v24 = vld [vmem:[#allocation5 + $0xc8] sm:$0xff]  ;;  %v228_v28 = vld [vmem:[#allocation5 + $0xc0] sm:$0xff]  ;;  %v1026_v11 = vmov 1.0  }
  0x3d   :  { %796 = vmatprep.subr.mxu1 %v264_v13  ;;  %741 = vmatpush3.msra.mxu0 %v216_v14  ;;  %v261_v25 = vld [vmem:[#allocation5 + $0x1c8] sm:$0xff]  ;;  %v260_v29 = vld [vmem:[#allocation5 + $0x1c0] sm:$0xff]  ;;  %v227_v32 = vld [vmem:[#allocation5 + $0xb8] sm:$0xff] }
  0x3e   :  { %797 = vmatpush3.msra.mxu1 %v248_v15  ;;  %742 = vmatprep.subr.mxu0 %v231_v16  ;;  %v213_v26 = vld [vmem:[#allocation5 + $0x48] sm:$0xff]  ;;  %v212_v30 = vld [vmem:[#allocation5 + $0x40] sm:$0xff]  ;;  %v259_v33 = vld [vmem:[#allocation5 + $0x1b8] sm:$0xff] }
  0x3f   :  { %798 = vmatprep.subr.mxu1 %v263_v17  ;;  %743 = vmatpush3.msra.mxu0 %v215_v18  ;;  %v245_v27 = vld [vmem:[#allocation5 + $0x148] sm:$0xff]  ;;  %v244_v31 = vld [vmem:[#allocation5 + $0x140] sm:$0xff]  ;;  %v211_v34 = vld [vmem:[#allocation5 + $0x38] sm:$0xff] }
  0x40   :  { %799 = vmatpush3.msra.mxu1 %v247_v19  ;;  %744 = vmatprep.subr.mxu0 %v230_v20  ;;  %v243_v35 = vld [vmem:[#allocation5 + $0x138] sm:$0xff]  ;;  %v226_v36 = vld [vmem:[#allocation5 + $0xb0] sm:$0xff]  ;;  %v225_v41 = vld [vmem:[#allocation5 + $0xa8] sm:$0xff] }
  0x41   :  { %800 = vmatprep.subr.mxu1 %v262_v21  ;;  %745 = vmatpush3.msra.mxu0 %v214_v22  ;;  %v258_v37 = vld [vmem:[#allocation5 + $0x1b0] sm:$0xff]  ;;  %v257_v42 = vld [vmem:[#allocation5 + $0x1a8] sm:$0xff]  ;;  %v224_v45 = vld [vmem:[#allocation5 + $0xa0] sm:$0xff] }
  0x42   :  { %801 = vmatpush3.msra.mxu1 %v246_v23  ;;  %746 = vmatprep.subr.mxu0 %v229_v24  ;;  %v210_v38 = vld [vmem:[#allocation5 + $0x30] sm:$0xff]  ;;  %v209_v43 = vld [vmem:[#allocation5 + $0x28] sm:$0xff]  ;;  %v256_v46 = vld [vmem:[#allocation5 + $0x1a0] sm:$0xff] }
  0x43   :  { %802 = vmatprep.subr.mxu1 %v261_v25  ;;  %747 = vmatpush3.msra.mxu0 %v213_v26  ;;  %v242_v39 = vld [vmem:[#allocation5 + $0x130] sm:$0xff]  ;;  %v241_v44 = vld [vmem:[#allocation5 + $0x128] sm:$0xff]  ;;  %v208_v47 = vld [vmem:[#allocation5 + $0x20] sm:$0xff] }
  0x44   :  { %803 = vmatpush3.msra.mxu1 %v245_v27  ;;  %748 = vmatprep.subr.mxu0 %v228_v28  ;;  %v240_v48 = vld [vmem:[#allocation5 + $0x120] sm:$0xff]  ;;  %v223_v50 = vld [vmem:[#allocation5 + $0x98] sm:$0xff]  ;;  %v222_v54 = vld [vmem:[#allocation5 + $0x90] sm:$0xff] }
  0x45   :  { %804 = vmatprep.subr.mxu1 %v260_v29  ;;  %749 = vmatpush3.msra.mxu0 %v212_v30  ;;  %v255_v51 = vld [vmem:[#allocation5 + $0x198] sm:$0xff]  ;;  %v254_v55 = vld [vmem:[#allocation5 + $0x190] sm:$0xff]  ;;  %v221_v58 = vld [vmem:[#allocation5 + $0x88] sm:$0xff] }
  0x46   :  { %805 = vmatpush3.msra.mxu1 %v244_v31  ;;  %750 = vmatprep.subr.mxu0 %v227_v32  ;;  %v207_v52 = vld [vmem:[#allocation5 + $0x18] sm:$0xff]  ;;  %v206_v56 = vld [vmem:[#allocation5 + $0x10] sm:$0xff]  ;;  %v253_v60 = vld [vmem:[#allocation5 + $0x188] sm:$0xff] }
  0x47   :  { %806 = vmatprep.subr.mxu1 %v259_v33  ;;  %751 = vmatpush3.msra.mxu0 %v211_v34  ;;  %v239_v53 = vld [vmem:[#allocation5 + $0x118] sm:$0xff]  ;;  %v238_v57 = vld [vmem:[#allocation5 + $0x110] sm:$0xff]  ;;  %v205_v61 = vld [vmem:[#allocation5 + $0x8] sm:$0xff] }
  0x48   :  { %807 = vmatpush3.msra.mxu1 %v243_v35  ;;  %752 = vmatprep.subr.mxu0 %v226_v36  ;;  %v72_v62 = vld [vmem:[#allocation2 + $0x8] sm:$0xff]  ;;  %v220_v1 = vld [vmem:[#allocation5 + $0x80] sm:$0xff]  ;;  %v74_v2 = vld [vmem:[#allocation2 + $0x18] sm:$0xff] }
  0x49   :  { %808 = vmatprep.subr.mxu1 %v258_v37  ;;  %753 = vmatpush3.msra.mxu0 %v210_v38  ;;  %v237_v0 = vld [vmem:[#allocation5 + $0x108] sm:$0xff]  ;;  %v252_v4 = vld [vmem:[#allocation5 + $0x180] sm:$0xff]  ;;  %v73_v6 = vld [vmem:[#allocation2 + $0x10] sm:$0xff]  ;;  %vm109_vm0 = vcmp.eq.s32.totalorder %v72_v62, %v1076_v59  ;;  %vm111_vm1 = vcmp.eq.s32.totalorder %v74_v2, %v1079_v63  ;;  %v1027_v38 = vmov 0.0  }
  0x4a   :  { %809 = vmatpush3.msra.mxu1 %v242_v39  ;;  %754 = vmatprep.subr.mxu0 %v225_v41  ;;  %v71_v5 = vld [vmem:[#allocation2] sm:$0xff]  ;;  %v76_v8 = vld [vmem:[#allocation2 + $0x28] sm:$0xff]  ;;  %v78_v9 = vld [vmem:[#allocation2 + $0x38] sm:$0xff]  ;;  %vm110_vm3 = vcmp.eq.s32.totalorder %v73_v6, %v1082_v3 }
  0x4b   :  { %810 = vmatprep.subr.mxu1 %v257_v42  ;;  %755 = vmatpush3.msra.mxu0 %v209_v43  ;;  %v204_v7 = vld [vmem:[#allocation5] sm:$0xff]  ;;  %vm108_vm2 = vcmp.eq.s32.totalorder %v71_v5, %v1073_v49  ;;  %vm113_vm4 = vcmp.eq.s32.totalorder %v76_v8, %v1076_v59  ;;  %vm115_vm5 = vcmp.eq.s32.totalorder %v78_v9, %v1079_v63  ;;  %v77_v13 = vld [vmem:[#allocation2 + $0x30] sm:$0xff]  ;;  %v80_v14 = vld [vmem:[#allocation2 + $0x48] sm:$0xff] }
  0x4c   :  { %811 = vmatpush3.msra.mxu1 %v241_v44  ;;  %756 = vmatprep.subr.mxu0 %v224_v45  ;;  %v236_v10 = vld [vmem:[#allocation5 + $0x100] sm:$0xff]  ;;  %v82_v15 = vld [vmem:[#allocation2 + $0x58] sm:$0xff]  ;;  %vm114_vm7 = vcmp.eq.s32.totalorder %v77_v13, %v1082_v3  ;;  %vm117_vm8 = vcmp.eq.s32.totalorder %v80_v14, %v1076_v59  ;;  %v81_v17 = vld [vmem:[#allocation2 + $0x50] sm:$0xff] }
  0x4d   :  { %812 = vmatprep.subr.mxu1 %v256_v46  ;;  %757 = vmatpush3.msra.mxu0 %v208_v47  ;;  %v75_v12 = vld [vmem:[#allocation2 + $0x20] sm:$0xff]  ;;  %vm119_vm9 = vcmp.eq.s32.totalorder %v82_v15, %v1079_v63  ;;  %v84_v18 = vld [vmem:[#allocation2 + $0x68] sm:$0xff]  ;;  %v86_v19 = vld [vmem:[#allocation2 + $0x78] sm:$0xff]  ;;  %vm118_vm11 = vcmp.eq.s32.totalorder %v81_v17, %v1082_v3 }
  0x4e   :  { %813 = vmatpush3.msra.mxu1 %v240_v48  ;;  %758 = vmatprep.subr.mxu0 %v223_v50  ;;  %vm112_vm6 = vcmp.eq.s32.totalorder %v75_v12, %v1073_v49  ;;  %v79_v16 = vld [vmem:[#allocation2 + $0x40] sm:$0xff]  ;;  %vm121_vm12 = vcmp.eq.s32.totalorder %v84_v18, %v1076_v59  ;;  %vm123_vm13 = vcmp.eq.s32.totalorder %v86_v19, %v1079_v63  ;;  %v85_v21 = vld [vmem:[#allocation2 + $0x70] sm:$0xff]  ;;  %v88_v22 = vld [vmem:[#allocation2 + $0x88] sm:$0xff] }
  0x4f   :  { %814 = vmatprep.subr.mxu1 %v255_v51  ;;  %759 = vmatpush3.msra.mxu0 %v207_v52  ;;  %vm116_vm10 = vcmp.eq.s32.totalorder %v79_v16, %v1073_v49  ;;  %v83_v20 = vld [vmem:[#allocation2 + $0x60] sm:$0xff]  ;;  %v90_v23 = vld [vmem:[#allocation2 + $0x98] sm:$0xff]  ;;  %vm122_vm15 = vcmp.eq.s32.totalorder %v85_v21, %v1082_v3  ;;  %v89_v25 = vld [vmem:[#allocation2 + $0x90] sm:$0xff] }
  0x50   :  { %815 = vmatpush3.msra.mxu1 %v239_v53  ;;  %760 = vmatprep.subr.mxu0 %v222_v54  ;;  %vm120_vm14 = vcmp.eq.s32.totalorder %v83_v20, %v1073_v49  ;;  %v87_v24 = vld [vmem:[#allocation2 + $0x80] sm:$0xff]  ;;  %v92_v26 = vld [vmem:[#allocation2 + $0xa8] sm:$0xff]  ;;  %v94_v27 = vld [vmem:[#allocation2 + $0xb8] sm:$0xff] }
  0x51   :  { %816 = vmatprep.subr.mxu1 %v254_v55  ;;  %761 = vmatpush3.msra.mxu0 %v206_v56  ;;  %v91_v28 = vld [vmem:[#allocation2 + $0xa0] sm:$0xff]  ;;  %v93_v29 = vld [vmem:[#allocation2 + $0xb0] sm:$0xff]  ;;  %v96_v30 = vld [vmem:[#allocation2 + $0xc8] sm:$0xff] }
  0x52   :  { %817 = vmatpush3.msra.mxu1 %v238_v57  ;;  %762 = vmatprep.subr.mxu0 %v221_v58  ;;  %v98_v31 = vld [vmem:[#allocation2 + $0xd8] sm:$0xff]  ;;  %v95_v32 = vld [vmem:[#allocation2 + $0xc0] sm:$0xff]  ;;  %v97_v33 = vld [vmem:[#allocation2 + $0xd0] sm:$0xff] }
  0x53   :  { %818 = vmatprep.subr.mxu1 %v253_v60  ;;  %763 = vmatpush3.msra.mxu0 %v205_v61  ;;  %v100_v34 = vld [vmem:[#allocation2 + $0xe8] sm:$0xff]  ;;  %v102_v35 = vld [vmem:[#allocation2 + $0xf8] sm:$0xff]  ;;  %v99_v36 = vld [vmem:[#allocation2 + $0xe0] sm:$0xff] }
  0x54   :  { %819 = vmatpush3.msra.mxu1 %v237_v0  ;;  %764 = vmatprep.subr.mxu0 %v220_v1  ;;  %v101_v37 = vld [vmem:[#allocation2 + $0xf0] sm:$0xff]  ;;  %v558_v39 = vld [vmem:[#allocation8 + $0x78] sm:$0xff]  ;;  %v557_v40 = vld [vmem:[#allocation8 + $0x70] sm:$0xff] }
  0x55   :  { %820 = vmatprep.subr.mxu1 %v252_v4  ;;  %765 = vmatpush3.msra.mxu0 %v204_v7  ;;  %v556_v41 = vld [vmem:[#allocation8 + $0x68] sm:$0xff]  ;;  %v555_v42 = vld [vmem:[#allocation8 + $0x60] sm:$0xff]  ;;  %v554_v43 = vld [vmem:[#allocation8 + $0x58] sm:$0xff] }
  0x56   :  { %702 = vmatprep.mubr.msk.f32.mxu0 %vm109_vm0, %v1026_v11  ;;  %821 = vmatpush3.msra.mxu1 %v236_v10  ;;  %vm125_vm0 = vcmp.eq.s32.totalorder %v88_v22, %v1076_v59  ;;  %v553_v44 = vld [vmem:[#allocation8 + $0x50] sm:$0xff]  ;;  %v552_v45 = vld [vmem:[#allocation8 + $0x48] sm:$0xff]  ;;  %v551_v46 = vld [vmem:[#allocation8 + $0x40] sm:$0xff] }
  0x57   :  { %718 = vmatprep.mubr.msk.f32.mxu1 %vm111_vm1, %v1026_v11  ;;  %703 = vmatmul.mubr.msk.f32.vlgmr.msra.gmra.mxu0 %vm108_vm2, %v1026_v11  ;;  %vm127_vm1 = vcmp.eq.s32.totalorder %v90_v23, %v1079_v63  ;;  %vm124_vm2 = vcmp.eq.s32.totalorder %v87_v24, %v1073_v49  ;;  %v550_v47 = vld [vmem:[#allocation8 + $0x38] sm:$0xff]  ;;  %v549_v48 = vld [vmem:[#allocation8 + $0x30] sm:$0xff]  ;;  %v547_v50 = vld [vmem:[#allocation8 + $0x20] sm:$0xff] }
  0x58   :  { %719 = vmatmul.mubr.msk.f32.vlgmr.msra.gmra.mxu1 %vm110_vm3, %v1026_v11  ;;  %704 = vmatprep.mubr.msk.f32.mxu0 %vm113_vm4, %v1026_v11  ;;  %vm126_vm3 = vcmp.eq.s32.totalorder %v89_v25, %v1082_v3  ;;  %vm129_vm4 = vcmp.eq.s32.totalorder %v92_v26, %v1076_v59  ;;  %v546_v51 = vld [vmem:[#allocation8 + $0x18] sm:$0xff]  ;;  %v545_v52 = vld [vmem:[#allocation8 + $0x10] sm:$0xff]  ;;  %v544_v53 = vld [vmem:[#allocation8 + $0x8] sm:$0xff] }
  0x59   :  { %720 = vmatprep.mubr.msk.f32.mxu1 %vm115_vm5, %v1026_v11  ;;  %vm131_vm5 = vcmp.eq.s32.totalorder %v94_v27, %v1079_v63  ;;  %863 = vmatprep.subr.mxu0 %v1027_v38  ;;  %v543_v54 = vld [vmem:[#allocation8] sm:$0xff]  ;;  %v1148_v9 = vld [vmem:[#allocation7] sm:$0xff] }
  0x5a   :  { %864 = vmatpush3.msra.mxu0 %v558_v39 }
  0x5b   :  { %705 = vmatmul.mubr.msk.f32.gmra.mxu0 %vm112_vm6, %v1026_v11  ;;  %vm128_vm6 = vcmp.eq.s32.totalorder %v91_v28, %v1073_v49  ;;  %865 = vmatprep.subr.mxu0 %v1027_v38 }
  0x5c   :  { %721 = vmatmul.mubr.msk.f32.gmra.mxu1 %vm114_vm7, %v1026_v11  ;;  %706 = vmatprep.mubr.msk.f32.mxu0 %vm117_vm8, %v1026_v11  ;;  %vm130_vm7 = vcmp.eq.s32.totalorder %v93_v29, %v1082_v3  ;;  %vm133_vm8 = vcmp.eq.s32.totalorder %v96_v30, %v1076_v59 }
  0x5d   :  { %722 = vmatprep.mubr.msk.f32.mxu1 %vm119_vm9, %v1026_v11  ;;  %vm135_vm9 = vcmp.eq.s32.totalorder %v98_v31, %v1079_v63  ;;  %866 = vmatpush3.msra.mxu0 %v557_v40 }
  0x5e   :  { %867 = vmatprep.subr.mxu0 %v1027_v38 }
  0x5f   :  { %707 = vmatmul.mubr.msk.f32.gmra.mxu0 %vm116_vm10, %v1026_v11  ;;  %vm132_vm10 = vcmp.eq.s32.totalorder %v95_v32, %v1073_v49 }
  0x60   :  { %723 = vmatmul.mubr.msk.f32.gmra.mxu1 %vm118_vm11, %v1026_v11  ;;  %708 = vmatprep.mubr.msk.f32.mxu0 %vm121_vm12, %v1026_v11  ;;  %vm134_vm11 = vcmp.eq.s32.totalorder %v97_v33, %v1082_v3  ;;  %vm137_vm12 = vcmp.eq.s32.totalorder %v100_v34, %v1076_v59 }
  0x61   :  { %724 = vmatprep.mubr.msk.f32.mxu1 %vm123_vm13, %v1026_v11  ;;  %vm139_vm13 = vcmp.eq.s32.totalorder %v102_v35, %v1079_v63  ;;  %868 = vmatpush3.msra.mxu0 %v556_v41 }
  0x62   :  { %869 = vmatprep.subr.mxu0 %v1027_v38 }
  0x63   :  { %709 = vmatmul.mubr.msk.f32.gmra.mxu0 %vm120_vm14, %v1026_v11  ;;  %vm136_vm14 = vcmp.eq.s32.totalorder %v99_v36, %v1073_v49  ;;  %v548_v49 = vld [vmem:[#allocation8 + $0x28] sm:$0xff] }
  0x64   :  { %725 = vmatmul.mubr.msk.f32.gmra.mxu1 %vm122_vm15, %v1026_v11  ;;  %710 = vmatprep.mubr.msk.f32.mxu0 %vm125_vm0, %v1026_v11  ;;  %vm138_vm15 = vcmp.eq.s32.totalorder %v101_v37, %v1082_v3  ;;  %vm1028_vm0 = vmmov 0  }
  0x65   :  { %726 = vmatprep.mubr.msk.f32.mxu1 %vm127_vm1, %v1026_v11  ;;  %870 = vmatpush3.msra.mxu0 %v555_v42  ;;  %vm567_vm1 = vcmask 1041409  }
  0x66   :  { %871 = vmatprep.subr.mxu0 %v1027_v38 }
  0x67   :  { %711 = vmatmul.mubr.msk.f32.gmra.mxu0 %vm124_vm2, %v1026_v11  ;;  %vm569_vm2 = vcmask 1042434  }
  0x68   :  { %727 = vmatmul.mubr.msk.f32.gmra.mxu1 %vm126_vm3, %v1026_v11  ;;  %712 = vmatprep.mubr.msk.f32.mxu0 %vm129_vm4, %v1026_v11  ;;  %vm571_vm3 = vcmask 1043459   ;;  %vm573_vm4 = vcmask 1044484  }
  0x69   :  { %728 = vmatprep.mubr.msk.f32.mxu1 %vm131_vm5, %v1026_v11  ;;  %872 = vmatpush3.msra.mxu0 %v554_v43  ;;  %vm575_vm5 = vcmask 1045509  }
  0x6a   :  { %873 = vmatprep.subr.mxu0 %v1027_v38 }
  0x6b   :  { %713 = vmatmul.mubr.msk.f32.gmra.mxu0 %vm128_vm6, %v1026_v11  ;;  %vm577_vm6 = vcmask 1046534  }
  0x6c   :  { %729 = vmatmul.mubr.msk.f32.gmra.mxu1 %vm130_vm7, %v1026_v11  ;;  %714 = vmatprep.mubr.msk.f32.mxu0 %vm133_vm8, %v1026_v11  ;;  %vm579_vm7 = vcmask 1047559  }
  0x6d   :  { %730 = vmatprep.mubr.msk.f32.mxu1 %vm135_vm9, %v1026_v11  ;;  %874 = vmatpush3.msra.mxu0 %v553_v44 }
  0x6e   :  { %875 = vmatprep.subr.mxu0 %v1027_v38 }
  0x6f   :  { %715 = vmatmul.mubr.msk.f32.gmra.mxu0 %vm132_vm10, %v1026_v11 }
  0x70   :  { %731 = vmatmul.mubr.msk.f32.gmra.mxu1 %vm134_vm11, %v1026_v11  ;;  %716 = vmatprep.mubr.msk.f32.mxu0 %vm137_vm12, %v1026_v11 }
  0x71   :  { %732 = vmatprep.mubr.msk.f32.mxu1 %vm139_vm13, %v1026_v11  ;;  %876 = vmatpush3.msra.mxu0 %v552_v45 }
  0x72   :  { %877 = vmatprep.subr.mxu0 %v1027_v38 }
  0x73   :  { %717 = vmatmul.mubr.msk.f32.gmra.mxu0 %vm136_vm14, %v1026_v11 }
  0x74   :  { %733 = vmatmul.mubr.msk.f32.gmra.mxu1 %vm138_vm15, %v1026_v11  ;;  %878 = vmatpush3.msra.mxu0 %v551_v46 }
  0x75   :  { %879 = vmatprep.subr.mxu0 %v1027_v38  ;;  %895 = vmatprep.mubr.msk.f32.mxu0 %vm1028_vm0, %v1027_v38 }
  0x76   :  { %880 = vmatpush3.msra.mxu0 %v550_v47 }
  0x77   :  { %881 = vmatprep.subr.mxu0 %v1027_v38 }
  0x78   :  { %882 = vmatpush3.msra.mxu0 %v549_v48 }
  0x79   :  { %883 = vmatprep.subr.mxu0 %v1027_v38 }
  0x7a   :  { %884 = vmatpush3.msra.mxu0 %v548_v49 }
  0x7b   :  { %885 = vmatprep.subr.mxu0 %v1027_v38 }
  0x7c   :  { %886 = vmatpush3.msra.mxu0 %v547_v50 }
  0x7d   :  { %887 = vmatprep.subr.mxu0 %v1027_v38 }
  0x7e   :  { %888 = vmatpush3.msra.mxu0 %v546_v51 }
  0x7f   :  { %889 = vmatprep.subr.mxu0 %v1027_v38 }
  0x80   :  { %890 = vmatpush3.msra.mxu0 %v545_v52 }
  0x81   :  { %891 = vmatprep.subr.mxu0 %v1027_v38 }
  0x82   :  { %892 = vmatpush3.msra.mxu0 %v544_v53 }
  0x83   :  { %893 = vmatprep.subr.mxu0 %v1027_v38 }
  0x84   :  { %894 = vmatpush3.msra.mxu0 %v543_v54 }
 0x117   :  { %v766_v55 = vpop.f32.mrf.mxu0 }
 0x118   :  { %v822_v56 = vpop.f32.mrf.mxu1 }
 0x119   :  { %v767_v57 = vpop.f32.mrf.mxu0 }
 0x11a   :  { %v823_v58 = vpop.f32.mrf.mxu1  ;;  %v768_v61 = vadd.f32 %v767_v57, %v766_v55 }
 0x11b   :  { %v769_v59 = vpop.f32.mrf.mxu0  ;;  %v824_v62 = vadd.f32 %v823_v58, %v822_v56 }
 0x11c   :  { %v825_v60 = vpop.f32.mrf.mxu1 }
 0x11d   :  { %v770_v63 = vpop.f32.mrf.mxu0  ;;  %v440_v6 = vadd.f32 %v824_v62, %v768_v61 }
 0x11e   :  { %v826_v0 = vpop.f32.mrf.mxu1  ;;  %v771_v1 = vadd.f32 %v770_v63, %v769_v59 }
 0x11f   :  { %v827_v2 = vadd.f32 %v826_v0, %v825_v60  ;;  %v772_v3 = vpop.f32.mrf.mxu0  ;;  %v479_v16 = vadd.f32 %v1148_v9, %v440_v6 }
 0x120   :  { %v828_v4 = vpop.f32.mrf.mxu1 }
 0x121   :  { %v445_v5 = vadd.f32 %v827_v2, %v771_v1  ;;  %v773_v7 = vpop.f32.mrf.mxu0  ;;  %v487_v25 = vrot.slane %v479_v16, 4 }
 0x122   :  { %v829_v8 = vpop.f32.mrf.mxu1  ;;  %v774_v10 = vadd.f32 %v773_v7, %v772_v3 }
 0x123   :  { %v830_v11 = vadd.f32 %v829_v8, %v828_v4  ;;  %v775_v12 = vpop.f32.mrf.mxu0  ;;  %v480_v14 = vadd.f32 %v1148_v9, %v445_v5  ;;  %v488_v36 = vmax.f32 %v479_v16, %v487_v25 }
 0x124   :  { %v831_v13 = vpop.f32.mrf.mxu1 }
 0x125   :  { %v450_v15 = vadd.f32 %v830_v11, %v774_v10  ;;  %v776_v17 = vpop.f32.mrf.mxu0  ;;  %v493_v24 = vrot.slane %v480_v14, 4  ;;  %v489_v50 = vrot.slane %v488_v36, 2 }
 0x126   :  { %v832_v18 = vpop.f32.mrf.mxu1  ;;  %v777_v20 = vadd.f32 %v776_v17, %v775_v12 }
 0x127   :  { %v481_v19 = vadd.f32 %v1148_v9, %v450_v15  ;;  %v833_v21 = vadd.f32 %v832_v18, %v831_v13  ;;  %v778_v22 = vpop.f32.mrf.mxu0  ;;  %v494_v35 = vmax.f32 %v480_v14, %v493_v24  ;;  %v490_v0 = vmax.f32 %v488_v36, %v489_v50 }
 0x128   :  { %v834_v23 = vpop.f32.mrf.mxu1 }
 0x129   :  { %v499_v26 = vrot.slane %v481_v19, 4  ;;  %v455_v27 = vadd.f32 %v833_v21, %v777_v20  ;;  %v779_v28 = vpop.f32.mrf.mxu0  ;;  %v495_v48 = vrot.slane %v494_v35, 2  ;;  %v491_v18 = vrot.slane %v490_v0, 1 }
 0x12a   :  { %v835_v29 = vpop.f32.mrf.mxu1  ;;  %v780_v30 = vadd.f32 %v779_v28, %v778_v22 }
 0x12b   :  { %v482_v31 = vadd.f32 %v1148_v9, %v455_v27  ;;  %v836_v32 = vadd.f32 %v835_v29, %v834_v23  ;;  %v781_v33 = vpop.f32.mrf.mxu0  ;;  %v500_v37 = vmax.f32 %v481_v19, %v499_v26  ;;  %v496_v62 = vmax.f32 %v494_v35, %v495_v48 }
 0x12c   :  { %v837_v34 = vpop.f32.mrf.mxu1  ;;  %v492_v29 = vmax.f32 %v490_v0, %v491_v18 }
 0x12d   :  { %v505_v38 = vrot.slane %v482_v31, 4  ;;  %v460_v39 = vadd.f32 %v836_v32, %v780_v30  ;;  %v782_v40 = vpop.f32.mrf.mxu0  ;;  %v501_v51 = vrot.slane %v500_v37, 2  ;;  %v497_v13 = vrot.slane %v496_v62, 1 }
 0x12e   :  { %v838_v41 = vpop.f32.mrf.mxu1  ;;  %v783_v42 = vadd.f32 %v782_v40, %v781_v33 }
 0x12f   :  { %v839_v43 = vadd.f32 %v838_v41, %v837_v34  ;;  %v506_v44 = vmax.f32 %v482_v31, %v505_v38  ;;  %v483_v45 = vadd.f32 %v1148_v9, %v460_v39  ;;  %v784_v46 = vpop.f32.mrf.mxu0  ;;  %v502_v1 = vmax.f32 %v500_v37, %v501_v51 }
 0x130   :  { %v840_v47 = vpop.f32.mrf.mxu1  ;;  %v498_v24 = vmax.f32 %v496_v62, %v497_v13  ;;  %v535_v39 = vmax.f32 %v492_v29, 0.0 }
 0x131   :  { %v465_v49 = vadd.f32 %v839_v43, %v783_v42  ;;  %v511_v52 = vrot.slane %v483_v45, 4  ;;  %v785_v53 = vpop.f32.mrf.mxu0  ;;  %v507_v55 = vrot.slane %v506_v44, 2  ;;  %v503_v16 = vrot.slane %v502_v1, 1 }
 0x132   :  { %v841_v54 = vpop.f32.mrf.mxu1  ;;  %v786_v57 = vadd.f32 %v785_v53, %v784_v46  ;;  %v536_v34 = vmax.f32 %v498_v24, 0.0 }
 0x133   :  { %v484_v56 = vadd.f32 %v1148_v9, %v465_v49  ;;  %v512_v58 = vmax.f32 %v483_v45, %v511_v52  ;;  %v842_v59 = vadd.f32 %v841_v54, %v840_v47  ;;  %v787_v60 = vpop.f32.mrf.mxu0  ;;  %v508_v6 = vmax.f32 %v506_v44, %v507_v55 }
 0x134   :  { %v843_v61 = vpop.f32.mrf.mxu1  ;;  %v504_v27 = vmax.f32 %v502_v1, %v503_v16  ;;  %v568_v43 = vsel %vm567_vm1, %v536_v34, %v535_v39 }
 0x135   :  { %v517_v63 = vrot.slane %v484_v56, 4  ;;  %v513_v2 = vrot.slane %v512_v58, 2  ;;  %v470_v3 = vadd.f32 %v842_v59, %v786_v57  ;;  %v788_v4 = vpop.f32.mrf.mxu0  ;;  %v509_v19 = vrot.slane %v508_v6, 1 }
 0x136   :  { %v844_v5 = vpop.f32.mrf.mxu1  ;;  %v789_v8 = vadd.f32 %v788_v4, %v787_v60  ;;  %v537_v37 = vmax.f32 %v504_v27, 0.0 }
 0x137   :  { %v518_v7 = vmax.f32 %v484_v56, %v517_v63  ;;  %v845_v10 = vadd.f32 %v844_v5, %v843_v61  ;;  %v514_v11 = vmax.f32 %v512_v58, %v513_v2  ;;  %v485_v12 = vadd.f32 %v1148_v9, %v470_v3 }
 0x138   :  { %v510_v30 = vmax.f32 %v508_v6, %v509_v19  ;;  %v570_v46 = vsel %vm569_vm2, %v537_v37, %v568_v43 }
 0x139   :  { %v519_v14 = vrot.slane %v518_v7, 2  ;;  %v475_v15 = vadd.f32 %v845_v10, %v789_v8  ;;  %v523_v17 = vrot.slane %v485_v12, 4  ;;  %v515_v22 = vrot.slane %v514_v11, 1 }
 0x13b   :  { %v520_v20 = vmax.f32 %v518_v7, %v519_v14  ;;  %v486_v21 = vadd.f32 %v1148_v9, %v475_v15  ;;  %v524_v23 = vmax.f32 %v485_v12, %v523_v17  ;;  %v516_v32 = vmax.f32 %v514_v11, %v515_v22 }
 0x13c   :  { %v538_v9 = vmax.f32 %v510_v30, 0.0 }
 0x13d   :  { %v521_v25 = vrot.slane %v520_v20, 1  ;;  %v529_v26 = vrot.slane %v486_v21, 4  ;;  %v525_v28 = vrot.slane %v524_v23, 2  ;;  %v539_v41 = vmax.f32 %v516_v32, 0.0 }
 0x13e   :  { %v572_v49 = vsel %vm571_vm3, %v538_v9, %v570_v46 }
 0x13f   :  { %v530_v31 = vmax.f32 %v486_v21, %v529_v26  ;;  %v526_v33 = vmax.f32 %v524_v23, %v525_v28  ;;  %v522_v35 = vmax.f32 %v520_v20, %v521_v25  ;;  %v574_v50 = vsel %vm573_vm4, %v539_v41, %v572_v49 }
 0x141   :  { %v531_v36 = vrot.slane %v530_v31, 2  ;;  %v527_v38 = vrot.slane %v526_v33, 1  ;;  %v540_v44 = vmax.f32 %v522_v35, 0.0 }
 0x143   :  { %v532_v40 = vmax.f32 %v530_v31, %v531_v36  ;;  %v528_v42 = vmax.f32 %v526_v33, %v527_v38  ;;  %v576_v52 = vsel %vm575_vm5, %v540_v44, %v574_v50 }
 0x145   :  { %v533_v45 = vrot.slane %v532_v40, 1  ;;  %v541_v47 = vmax.f32 %v528_v42, 0.0 }
 0x147   :  { %v534_v48 = vmax.f32 %v532_v40, %v533_v45  ;;  %v578_v53 = vsel %vm577_vm6, %v541_v47, %v576_v52 }
 0x149   :  { %v542_v51 = vmax.f32 %v534_v48, 0.0 }
 0x14b   :  { %v580_v54 = vsel %vm579_vm7, %v542_v51, %v578_v53 }
 0x14c   :  { %896 = vmatmul.mubr.f32.vlgmr.msra.gmra.mxu0 %v580_v54 }
 0x20c   :  { %v648_v55 = vpop.f32.mrf.mxu0 }
 0x20d   :  { %652 = vst [vmem:[#allocation10] sm:$0xff] %v648_v55 }
 0x20e   :  { %v897_v56 = vpop.f32.mrf.mxu0 }
 0x20f   :  { %1001 = shalt.err (!%p998_p10)
}
 0x210   :  { %662 = dma.vmem_to_hbm [thread:$0]  %s660_s3, 128, %s1165_s4, [#allocation4]  }
 0x211   :  { %1016 = dma.done.wait [#allocation4], 128  }
 0x212   :  { %1017 = vsyncadd [#allocation4], 4294967168 }
 0x213   :  { %666 = vsyncpa [#allocation3], 1 }
 0x214   :  { %667 = vsyncpa [#allocation6], 1 }
 0x215   :  { %668 = vsyncpa [#allocation9], 1 }
 0x216   :  { %669 = vsyncpa [#allocation4], 1 }

</bundles_post_ra>
